<compile_context>
chip_gen: v5e
topology: v5e:2x2
jax: 0.10.0
libtpu: 0.0.40
codegen_flags: <defaults>
</compile_context>

<pallas_src>
import functools

import jax
import jax.numpy as jnp
from jax import lax
from jax.experimental import pallas as pl
from jax.experimental.pallas import tpu as pltpu

EPS = 1e-5


# ---------------------------------------------------------------------------
# bn1 partial statistics over the external NCHW input x (single read of x)
# ---------------------------------------------------------------------------
def _bn_stats_nchw_kernel(x_ref, ps_ref, pss_ref):
    xv = x_ref[0].astype(jnp.float32)                 # (Cin, H, W)
    s = jnp.sum(xv, axis=2)                           # (Cin, H)
    ss = jnp.sum(xv * xv, axis=2)
    ps_ref[0] = jnp.sum(s, axis=1, keepdims=True)     # (Cin, 1)
    pss_ref[0] = jnp.sum(ss, axis=1, keepdims=True)


def bn_stats_nchw(x):
    N, Cin, H, W = x.shape
    return pl.pallas_call(
        _bn_stats_nchw_kernel,
        out_shape=(jax.ShapeDtypeStruct((N, Cin, 1), jnp.float32),
                   jax.ShapeDtypeStruct((N, Cin, 1), jnp.float32)),
        grid=(N,),
        in_specs=[pl.BlockSpec((1, Cin, H, W), lambda n: (n, 0, 0, 0))],
        out_specs=(pl.BlockSpec((1, Cin, 1), lambda n: (n, 0, 0)),
                   pl.BlockSpec((1, Cin, 1), lambda n: (n, 0, 0))),
        compiler_params=pltpu.CompilerParams(dimension_semantics=("parallel",)),
    )(x)


def _finalize_stats(ps, pss, count):
    """Per-channel batch mean/var from per-image partial (sum, sum_sq)."""
    mean = jnp.sum(ps, axis=0) / count
    var = jnp.sum(pss, axis=0) / count - mean * mean
    # One-pass E[x^2]-mean^2 can go slightly negative; clamp.
    return mean, jnp.maximum(var, 0.0)


# ---------------------------------------------------------------------------
# Fused  (BN affine [-> PReLU]) -> 3x3 conv (stride s)  + partial output stats
# ---------------------------------------------------------------------------
def _affine_conv3x3_kernel(x_ref, scale_ref, shift_ref, alpha_ref, w_ref,
                           o_ref, ps_ref, pss_ref, pad_ref,
                           *, use_prelu, stride, channels_first_in,
                           channels_major_out, Ho, Wo):
    Hp2, Wp2, Cin = pad_ref.shape
    H, W = Hp2 - 2, Wp2 - 2
    Cout = w_ref.shape[2]

    # ---- BN affine (+ optional PReLU), f32 on the VPU ---------------------
    if channels_first_in:
        # NCHW image: merge spatial dims, one 2-D transpose -> channels last.
        xv = jnp.transpose(x_ref[0].astype(jnp.float32).reshape(Cin, H * W))
    else:
        xv = x_ref[0].astype(jnp.float32).reshape(H * W, Cin)
    t = xv * scale_ref[...] + shift_ref[...]                  # (H*W, Cin)
    if use_prelu:
        t = jnp.where(t >= 0, t, alpha_ref[...] * t)
    tb = t.astype(jnp.bfloat16).reshape(H, W, Cin)            # MXU operand dtype

    # ---- bf16 zero-padded conv input in VMEM: write only the 1-px ring ----
    zrow = jnp.zeros((1, W + 2, Cin), pad_ref.dtype)
    pad_ref[0:1, :, :] = zrow
    pad_ref[H + 1:H + 2, :, :] = zrow
    zcol = jnp.zeros((H, 1, Cin), pad_ref.dtype)
    pad_ref[1:H + 1, 0:1, :] = zcol
    pad_ref[1:H + 1, W + 1:W + 2, :] = zcol
    pad_ref[1:H + 1, 1:W + 1, :] = tb

    # ---- 3 accumulating MXU matmuls (one per kernel row, K = 3*Cin) -------
    # Only one (Ho*Wo, 3*Cin) bf16 slab is live at a time; f32 accumulation.
    acc = jnp.zeros((Ho * Wo, Cout), jnp.float32)
    for ky in range(3):
        if stride == 1:
            taps = [pad_ref[ky:ky + Ho, kx:kx + Wo, :] for kx in range(3)]
        else:
            taps = [pad_ref[pl.ds(ky, Ho, stride), pl.ds(kx, Wo, stride), :]
                    for kx in range(3)]
        slab = jnp.concatenate(taps, axis=-1).reshape(Ho * Wo, 3 * Cin)
        acc = acc + jnp.dot(slab, w_ref[ky],
                            preferred_element_type=jnp.float32)

    # ---- store (channel-major output is lane-dense: lanes = Ho*Wo) --------
    if channels_major_out:
        o_ref[0] = jnp.transpose(acc).astype(o_ref.dtype)     # (Cout, Ho*Wo)
    else:
        o_ref[0] = acc.reshape(Ho, Wo, Cout).astype(o_ref.dtype)

    # Fused per-image partial BN statistics of the conv output (f32 acc).
    ps_ref[0] = jnp.sum(acc, axis=0, keepdims=True)           # (1, Cout)
    pss_ref[0] = jnp.sum(acc * acc, axis=0, keepdims=True)


def affine_conv3x3(x, scale, shift, alpha, w3, *, use_prelu, stride,
                   channels_first_in, channels_major_out, out_dtype):
    """y[n] = conv3x3(prelu?(scale*x[n]+shift), w), stride s, 'same' padding."""
    if channels_first_in:
        N, Cin, H, W = x.shape
    else:
        N, H, W, Cin = x.shape
    Cout = w3.shape[2]
    Ho = (H - 1) // stride + 1
    Wo = (W - 1) // stride + 1

    kernel = functools.partial(
        _affine_conv3x3_kernel, use_prelu=use_prelu, stride=stride,
        channels_first_in=channels_first_in,
        channels_major_out=channels_major_out, Ho=Ho, Wo=Wo)

    x_block = (1, Cin, H, W) if channels_first_in else (1, H, W, Cin)
    if channels_major_out:
        o_shape = jax.ShapeDtypeStruct((N, Cout, Ho * Wo), out_dtype)
        o_spec = pl.BlockSpec((1, Cout, Ho * Wo), lambda n: (n, 0, 0))
    else:
        o_shape = jax.ShapeDtypeStruct((N, Ho, Wo, Cout), out_dtype)
        o_spec = pl.BlockSpec((1, Ho, Wo, Cout), lambda n: (n, 0, 0, 0))

    return pl.pallas_call(
        kernel,
        out_shape=(
            o_shape,
            jax.ShapeDtypeStruct((N, 1, Cout), jnp.float32),   # partial sum
            jax.ShapeDtypeStruct((N, 1, Cout), jnp.float32),   # partial sum sq
        ),
        grid=(N,),
        in_specs=[
            pl.BlockSpec(x_block, lambda n: (n, 0, 0, 0)),
            pl.BlockSpec((1, Cin), lambda n: (0, 0)),
            pl.BlockSpec((1, Cin), lambda n: (0, 0)),
            pl.BlockSpec((1, Cin), lambda n: (0, 0)),
            pl.BlockSpec((3, 3 * Cin, Cout), lambda n: (0, 0, 0)),
        ],
        out_specs=(
            o_spec,
            pl.BlockSpec((1, 1, Cout), lambda n: (n, 0, 0)),
            pl.BlockSpec((1, 1, Cout), lambda n: (n, 0, 0)),
        ),
        scratch_shapes=[pltpu.VMEM((H + 2, W + 2, Cin), jnp.bfloat16)],
        compiler_params=pltpu.CompilerParams(dimension_semantics=("parallel",)),
    )(x, scale, shift, alpha, w3)


# ---------------------------------------------------------------------------
# Downsample 1x1 strided conv, channel-major output, in-kernel stride + stats
# ---------------------------------------------------------------------------
def _conv1x1_kernel(x_ref, w_ref, o_ref, ps_ref, pss_ref, *, stride, Ho, Wo):
    Cin = x_ref.shape[1]
    if stride == 1:
        xs = x_ref[...]                                       # (1, Cin, H, W)
    else:
        # In-kernel stride-s spatial subsample (no wrapper-side strided copy).
        xs = x_ref[:, :, pl.ds(0, Ho, stride), pl.ds(0, Wo, stride)]
    slab = xs.reshape(Cin, Ho * Wo).astype(jnp.bfloat16)
    # Channel-major matmul: result lanes = Ho*Wo (lane-dense store).
    y = jnp.dot(w_ref[...], slab, preferred_element_type=jnp.float32)
    o_ref[0] = y                                              # (Cout, Ho*Wo)
    ps_ref[0] = jnp.sum(y, axis=1, keepdims=True)             # (Cout, 1)
    pss_ref[0] = jnp.sum(y * y, axis=1, keepdims=True)


def conv1x1_downsample(x_nchw, w_t_bf16, *, stride):
    N, Cin, H, W = x_nchw.shape
    Cout = w_t_bf16.shape[0]
    Ho = (H - 1) // stride + 1
    Wo = (W - 1) // stride + 1
    kernel = functools.partial(_conv1x1_kernel, stride=stride, Ho=Ho, Wo=Wo)
    return pl.pallas_call(
        kernel,
        out_shape=(jax.ShapeDtypeStruct((N, Cout, Ho * Wo), jnp.float32),
                   jax.ShapeDtypeStruct((N, Cout, 1), jnp.float32),
                   jax.ShapeDtypeStruct((N, Cout, 1), jnp.float32)),
        grid=(N,),
        in_specs=[pl.BlockSpec((1, Cin, H, W), lambda n: (n, 0, 0, 0)),
                  pl.BlockSpec((Cout, Cin), lambda n: (0, 0))],
        out_specs=(pl.BlockSpec((1, Cout, Ho * Wo), lambda n: (n, 0, 0)),
                   pl.BlockSpec((1, Cout, 1), lambda n: (n, 0, 0)),
                   pl.BlockSpec((1, Cout, 1), lambda n: (n, 0, 0))),
        compiler_params=pltpu.CompilerParams(dimension_semantics=("parallel",)),
    )(x_nchw, w_t_bf16)


# ---------------------------------------------------------------------------
# bn3 + residual-bn + add, channel-major:  out = sa*a + ba + sb*b + bb
# Output is (N, C, Ho*Wo) => final NCHW result is a free reshape.
# ---------------------------------------------------------------------------
def _affine_add_kernel(a_ref, b_ref, sa_ref, ba_ref, sb_ref, bb_ref, o_ref):
    o_ref[0] = (a_ref[0].astype(jnp.float32) * sa_ref[...] + ba_ref[...]
                + b_ref[0].astype(jnp.float32) * sb_ref[...] + bb_ref[...])


def fused_affine_add(a, b, sa, ba, sb, bb):
    N, C, S = a.shape
    vec = pl.BlockSpec((C, 1), lambda n: (0, 0))
    return pl.pallas_call(
        _affine_add_kernel,
        out_shape=jax.ShapeDtypeStruct((N, C, S), jnp.float32),
        grid=(N,),
        in_specs=[pl.BlockSpec((1, C, S), lambda n: (n, 0, 0)),
                  pl.BlockSpec((1, C, S), lambda n: (n, 0, 0)),
                  vec, vec, vec, vec],
        out_specs=pl.BlockSpec((1, C, S), lambda n: (n, 0, 0)),
        compiler_params=pltpu.CompilerParams(dimension_semantics=("parallel",)),
    )(a, b, sa, ba, sb, bb)


# ---------------------------------------------------------------------------
# BlockIR forward (wrapper, NCHW in / NCHW out like PyTorch)
# ---------------------------------------------------------------------------
def block_ir_forward(x_nchw, p, *, stride, dim_match):
    x = x_nchw.astype(jnp.float32)                  # NCHW throughout
    N, Cin, H, W = x.shape
    Cp = p["w1"].shape[-1]
    if dim_match:
        assert stride == 1 and Cin == Cp, (
            "dim_match=True requires stride == 1 and inplanes == planes")
    Ho = (H - 1) // stride + 1
    Wo = (W - 1) // stride + 1

    # bn1 batch stats (single NCHW read of x), folded into conv1's affine.
    ps0, pss0 = bn_stats_nchw(x)                               # (N, Cin, 1)
    m1, v1 = _finalize_stats(ps0, pss0, N * H * W)             # (Cin, 1)
    m1, v1 = m1.reshape(1, Cin), v1.reshape(1, Cin)
    s1 = p["g1"] / jnp.sqrt(v1 + EPS)
    b1 = p["b1"] - m1 * s1

    # conv1 (stride 1), NCHW input transposed in-kernel, bf16 output + stats.
    w1 = p["w1"].reshape(3, 3 * Cin, Cp).astype(jnp.bfloat16)
    dummy_alpha = jnp.zeros((1, Cin), jnp.float32)             # no PReLU here
    out1, ps1, pss1 = affine_conv3x3(
        x, s1, b1, dummy_alpha, w1, use_prelu=False, stride=1,
        channels_first_in=True, channels_major_out=False,
        out_dtype=jnp.bfloat16)                                # (N, H, W, Cp)
    m2, v2 = _finalize_stats(ps1, pss1, N * H * W)             # (1, Cp)
    s2 = p["g2"] / jnp.sqrt(v2 + EPS)
    b2 = p["b2"] - m2 * s2

    # bn2 + PReLU folded into conv2 (strided in-kernel); channel-major bf16
    # output (lane-dense) + fused bn3 partial stats.
    w2 = p["w2"].reshape(3, 3 * Cp, Cp).astype(jnp.bfloat16)
    out2, ps2, pss2 = affine_conv3x3(
        out1, s2, b2, p["alpha"], w2, use_prelu=True, stride=stride,
        channels_first_in=False, channels_major_out=True,
        out_dtype=jnp.bfloat16)                                # (N, Cp, Ho*Wo)
    m3, v3 = _finalize_stats(ps2, pss2, N * Ho * Wo)           # (1, Cp)
    s3v = p["g3"] / jnp.sqrt(v3 + EPS)
    b3v = p["b3"] - m3 * s3v
    s3, b3 = s3v.reshape(Cp, 1), b3v.reshape(Cp, 1)

    if dim_match:
        res = x.reshape(N, Cin, H * W)             # free view of NCHW x
        sr = jnp.ones((Cp, 1), jnp.float32)
        br = jnp.zeros((Cp, 1), jnp.float32)
    else:
        wdT = jnp.transpose(p["wd"]).astype(jnp.bfloat16)      # (Cp, Cin)
        res, psd, pssd = conv1x1_downsample(x, wdT, stride=stride)
        md, vd = _finalize_stats(psd, pssd, N * Ho * Wo)       # (Cp, 1)
        sr = p["gd"].reshape(Cp, 1) / jnp.sqrt(vd + EPS)
        br = p["bd"].reshape(Cp, 1) - md * sr

    out = fused_affine_add(out2, res, s3, b3, sr, br)          # (N, Cp, Ho*Wo)
    return out.reshape(N, Cp, Ho, Wo)              # free reshape to NCHW


# ---------------------------------------------------------------------------
# Pure-JAX fp32 reference (for validation)
# ---------------------------------------------------------------------------
def ref_forward(x_nchw, p, *, stride, dim_match):
    x = jnp.transpose(x_nchw, (0, 2, 3, 1)).astype(jnp.float32)

    def bn(y, g, b):
        m = y.mean(axis=(0, 1, 2))
        v = y.var(axis=(0, 1, 2))
        return (y - m) / jnp.sqrt(v + EPS) * g.reshape(-1) + b.reshape(-1)

    def conv(y, w, s, pad):
        return lax.conv_general_dilated(
            y, w, (s, s), [(pad, pad), (pad, pad)],
            dimension_numbers=("NHWC", "HWIO", "NHWC"),
            precision=lax.Precision.HIGHEST)

    out = bn(x, p["g1"], p["b1"])
    out = conv(out, p["w1"], 1, 1)
    out = bn(out, p["g2"], p["b2"])
    a = p["alpha"].reshape(-1)
    out = jnp.where(out >= 0, out, a * out)
    out = conv(out, p["w2"], stride, 1)
    out = bn(out, p["g3"], p["b3"])
    if dim_match:
        res = x
    else:
        wd = p["wd"].reshape((1, 1) + p["wd"].shape)
        res = conv(x, wd, stride, 0)
        res = bn(res, p["gd"], p["bd"])
    return jnp.transpose(out + res, (0, 3, 1, 2))


# ---------------------------------------------------------------------------
# Deterministic parameter init (matches nn.Module shapes; HWIO weights)
# ---------------------------------------------------------------------------
def init_params(key, inplanes, planes, dim_match):
    ks = jax.random.split(key, 12)
    p = {
        "g1": 1.0 + 0.1 * jax.random.normal(ks[0], (1, inplanes), jnp.float32),
        "b1": 0.1 * jax.random.normal(ks[1], (1, inplanes), jnp.float32),
        "w1": 0.1 * jax.random.normal(ks[2], (3, 3, inplanes, planes), jnp.float32),
        "g2": 1.0 + 0.1 * jax.random.normal(ks[3], (1, planes), jnp.float32),
        "b2": 0.1 * jax.random.normal(ks[4], (1, planes), jnp.float32),
        "alpha": 0.25 + 0.05 * jax.random.normal(ks[5], (1, planes), jnp.float32),
        "w2": 0.1 * jax.random.normal(ks[6], (3, 3, planes, planes), jnp.float32),
        "g3": 1.0 + 0.1 * jax.random.normal(ks[7], (1, planes), jnp.float32),
        "b3": 0.1 * jax.random.normal(ks[8], (1, planes), jnp.float32),
    }
    if not dim_match:
        p["wd"] = 0.1 * jax.random.normal(ks[9], (inplanes, planes), jnp.float32)
        p["gd"] = 1.0 + 0.1 * jax.random.normal(ks[10], (1, planes), jnp.float32)
        p["bd"] = 0.1 * jax.random.normal(ks[11], (1, planes), jnp.float32)
    return p


if __name__ == "__main__":
    key = jax.random.PRNGKey(0)
    kx1, kx2, kp1, kp2 = jax.random.split(key, 4)

    # Case 1: dim_match=True, stride=1 (inplanes == planes == 8)
    x1 = jax.random.normal(kx1, (2, 8, 16, 16), jnp.float32)  # NCHW
    p1 = init_params(kp1, 8, 8, True)
    y1 = block_ir_forward(x1, p1, stride=1, dim_match=True)
    y1_ref = ref_forward(x1, p1, stride=1, dim_match=True)

    # Case 2: dim_match=False, stride=2 (4 -> 8 channels, 16x16 -> 8x8)
    x2 = jax.random.normal(kx2, (2, 4, 16, 16), jnp.float32)  # NCHW
    p2 = init_params(kp2, 4, 8, False)
    y2 = block_ir_forward(x2, p2, stride=2, dim_match=False)
    y2_ref = ref_forward(x2, p2, stride=2, dim_match=False)

    jax.block_until_ready((y1, y2))
    assert y1.shape == (2, 8, 16, 16), y1.shape
    assert y2.shape == (2, 8, 8, 8), y2.shape
    # bf16 MXU operands + bf16 out1/out2 intermediates => relaxed tolerance.
    err1 = float(jnp.max(jnp.abs(y1 - y1_ref)))
    err2 = float(jnp.max(jnp.abs(y2 - y2_ref)))
    assert err1 < 7e-2 and err2 < 7e-2, (err1, err2)
    print("KERNEL_OK")
</pallas_src>

<mosaic_0001>
module attributes {stable_mosaic.version = 11 : i64} {
  func.func @_bn_stats_nchw_kernel(%arg0: i32, %arg1: memref<1x8x16x16xf32, #tpu.memory_space<vmem>>, %arg2: memref<1x8x1xf32, #tpu.memory_space<vmem>>, %arg3: memref<1x8x1xf32, #tpu.memory_space<vmem>>) attributes {dimension_semantics = [#tpu.dimension_semantics<parallel>], iteration_bounds = array<i64: 2>, scalar_prefetch = 0 : i64, scratch_operands = 0 : i64, tpu.core_type = #tpu.core_type<tc>, window_params = [{transform_indices = @transform_0, window_bounds = array<i64: 1, 8, 16, 16>}, {transform_indices = @transform_1, window_bounds = array<i64: 1, 8, 1>}, {transform_indices = @transform_2, window_bounds = array<i64: 1, 8, 1>}]} {
    %c0 = arith.constant 0 : index
    %c0_0 = arith.constant 0 : index
    %c0_1 = arith.constant 0 : index
    %c0_2 = arith.constant 0 : index
    %0 = vector.load %arg1[%c0, %c0_0, %c0_1, %c0_2] : memref<1x8x16x16xf32, #tpu.memory_space<vmem>>, vector<1x8x16x16xf32>
    %1 = vector.shape_cast %0 : vector<1x8x16x16xf32> to vector<8x16x16xf32>
    %cst = arith.constant dense<0.000000e+00> : vector<8x16xf32>
    %2 = vector.multi_reduction <add>, %1, %cst [2] : vector<8x16x16xf32> to vector<8x16xf32>
    %3 = arith.mulf %1, %1 : vector<8x16x16xf32>
    %cst_3 = arith.constant dense<0.000000e+00> : vector<8x16xf32>
    %4 = vector.multi_reduction <add>, %3, %cst_3 [2] : vector<8x16x16xf32> to vector<8x16xf32>
    %cst_4 = arith.constant dense<0.000000e+00> : vector<8xf32>
    %5 = vector.multi_reduction <add>, %2, %cst_4 [1] : vector<8x16xf32> to vector<8xf32>
    %6 = vector.shape_cast %5 : vector<8xf32> to vector<8x1xf32>
    %c0_5 = arith.constant 0 : index
    %c0_6 = arith.constant 0 : index
    %c0_7 = arith.constant 0 : index
    %7 = vector.load %arg2[%c0_5, %c0_6, %c0_7] : memref<1x8x1xf32, #tpu.memory_space<vmem>>, vector<1x8x1xf32>
    %8 = vector.shape_cast %7 : vector<1x8x1xf32> to vector<8x1xf32>
    %9 = vector.shape_cast %6 : vector<8x1xf32> to vector<1x8x1xf32>
    tpu.vector_store %arg2[%c0_5, %c0_6, %c0_7], %9 {strides = array<i32>} : memref<1x8x1xf32, #tpu.memory_space<vmem>>, vector<1x8x1xf32>,
    %cst_8 = arith.constant dense<0.000000e+00> : vector<8xf32>
    %10 = vector.multi_reduction <add>, %4, %cst_8 [1] : vector<8x16xf32> to vector<8xf32>
    %11 = vector.shape_cast %10 : vector<8xf32> to vector<8x1xf32>
    %c0_9 = arith.constant 0 : index
    %c0_10 = arith.constant 0 : index
    %c0_11 = arith.constant 0 : index
    %12 = vector.load %arg3[%c0_9, %c0_10, %c0_11] : memref<1x8x1xf32, #tpu.memory_space<vmem>>, vector<1x8x1xf32>
    %13 = vector.shape_cast %12 : vector<1x8x1xf32> to vector<8x1xf32>
    %14 = vector.shape_cast %11 : vector<8x1xf32> to vector<1x8x1xf32>
    tpu.vector_store %arg3[%c0_9, %c0_10, %c0_11], %14 {strides = array<i32>} : memref<1x8x1xf32, #tpu.memory_space<vmem>>, vector<1x8x1xf32>,
    return
  }
  func.func @transform_0(%arg0: i32) -> (i32, i32, i32, i32) {
    %c0_i32 = arith.constant 0 : i32
    %c0_i32_0 = arith.constant 0 : i32
    %c0_i32_1 = arith.constant 0 : i32
    %c0_i32_2 = arith.constant 0 : i32
    return %arg0, %c0_i32, %c0_i32_0, %c0_i32_1 : i32, i32, i32, i32
  }
  func.func @transform_1(%arg0: i32) -> (i32, i32, i32) {
    %c0_i32 = arith.constant 0 : i32
    %c0_i32_0 = arith.constant 0 : i32
    %c0_i32_1 = arith.constant 0 : i32
    return %arg0, %c0_i32, %c0_i32_0 : i32, i32, i32
  }
  func.func @transform_2(%arg0: i32) -> (i32, i32, i32) {
    %c0_i32 = arith.constant 0 : i32
    %c0_i32_0 = arith.constant 0 : i32
    %c0_i32_1 = arith.constant 0 : i32
    return %arg0, %c0_i32, %c0_i32_0 : i32, i32, i32
  }
}

</mosaic_0001>

<bundles_post_ra>
// kernel: tpu_custom_call.1
= control target key start
LH: loop header
LB: loop body
LE: loop exit
PB: predicated region body
PF: predicated region fallthrough
CT: control target
= control target key end

     0   :  { %8 = vsyncpa [#allocation3], 0  ;;  %s870_s0 = inlined_call_operand.hbm [shape: f32[2,8,16,16], index: 0, kind: input, shape index: {}]   ;;  %s871_s1 = inlined_call_operand.vmem [shape: f32[2,8,1], index: 1, kind: output, shape index: {0}]   ;;  %s872_s2 = inlined_call_operand.vmem [shape: f32[2,8,1], index: 2, kind: output, shape index: {1}]  }
   0x1   :  { %10 = vsyncpa [#allocation3 + $0x1], 0  ;;  %s653_s9 = smov 0   ;;  %s655_s10 = smov 0  }
   0x2   :  { %s657_s11 = smov 0   ;;  %s659_s12 = smov 0  }
   0x3 LB: > { %s672_s13 = sadd.s32 4294967295, %s634_s12   ;;  %s675_s14 = sadd.s32 1, %s634_s12   ;;  %s634_s12 = sphi %s659_s12, %s879_s12   ;;  %s630_s11 = sphi %s657_s11, %s878_s11   ;;  %s626_s10 = sphi %s655_s10, %s877_s10   ;;  %s622_s9 = sphi %s653_s9, %s876_s9  }
   0x4   : > { %s20_s15 = ssub.s32 %s634_s12, %s675_s14  ;;  %s23_s16 = sadd.s32 1, %s630_s11 }
   0x5   : > { %p21_p0 = scmp.eq.s32.totalorder %s20_s15, 0  ;;  %p30_p1 = scmp.ne.s32.totalorder %s630_s11, %s626_s10 }
   0x6   : > { %p31_p2 = scmp.eq.s32.totalorder %s634_s12, 0  ;;  %p36_p3 = scmp.ne.s32.totalorder %s626_s10, %s622_s9 }
   0x7   : > { %s685_s17 = scalar_select %p21_p0, %s630_s11, %s23_s16  }
   0x8   : > { %p687_p4 = por %p31_p2, %p30_p1  ;;  %p37_p5 = scmp.eq.s32.totalorder %s672_s13, 0 }
   0x9   : > { %p535_p6 = scmp.lt.s32.totalorder %s634_s12, 2  ;;  %s112_s20 = sand.u32 1, %s630_s11  }
   0xa   : > { %p693_p7 = por %p37_p5, %p36_p3  ;;  %s519_s21 = sshll.u32 %s112_s20, 7 }
   0xb   : > { %s528_s22 = sshll.u32 %s634_s12, 7  ;;  %s116_s26 = scalar_lea.vmem [#allocation2], %s519_s21 }
   0xc   : > { %s121_s25 = scalar_lea.hbm %s870_s0, %s528_s22  ;;  %s124_s27 = sshll.u32 %s116_s26, 4  ;;  %s125_s27 = int_to_ptr.vmem [resolvable:$true] %s124_s27 }
   0xd   : > { %s122_s28 = sshll.u32 %s121_s25, 4  ;;  %p704_p8 = pnand %p535_p6, %p687_p4  ;;  %s123_s28 = int_to_ptr.hbm [resolvable:$true] %s122_s28 }
   0xe   : > { %p522_p9 = scmp.ge.s32.totalorder %s634_s12, 1  ;;  %s113_s30 = scalar_lea.sflag [#allocation3], %s112_s20 }
   0xf   : > { %s570_s3 = sshra.s32 %s123_s28, 4  ;;  %p574_p11 = pneg %p704_p8  ;;  %s571_s3 = int_to_ptr.hbm [resolvable:$true] %s570_s3 }
  0x10   : > { %s572_s4 = scalar_lea.hbm %s571_s3, 128  ;;  %s577_s7 = scalar_lea.hbm %s870_s0, 256 }
  0x11   : > { %p573_p10 = scmp.ne.s32.totalorder %s571_s3, %s572_s4  ;;  %p578_p0 = scmp.lt.s32.totalorder %s571_s3, %s870_s0 }
  0x12   : > { %p579_p1 = scmp.lt.s32.totalorder %s577_s7, %s572_s4 }
  0x13   : > { %p575_p12 = pnand %p574_p11, %p573_p10 }
  0x14   : > { %p580_p2 = por %p579_p1, %p578_p0 }
  0x15   : > { %p576_p13 = pneg %p575_p12 }
  0x17   : > { %p581_p3 = pnand %p580_p2, %p576_p13 }
  0x19   : > { %584 = shalt.err (!%p581_p3)
}
  0x1a   : > { %s636_s15 = smov 128   ;;  %s637_s16 = smov 8  }
  0x1b   : > { %534 = dma.hbm_to_vmem [thread:$0]  (!%p704_p8), %s123_s28, 2048, %s125_s27, %s113_s30, %s636_s15, %s636_s15, %s637_s16  }
  0x1c   : > { %p132_p4 = scmp.lt.s32.totalorder %s634_s12, 3 }
  0x1e   : > { %p133_p5 = pnand %p522_p9, %p132_p4 }
  0x1f   : > { %s138_s18 = sand.u32 (!%p133_p5), 1, %s626_s10  }
  0x20   : > { %136 = sbr.rel (%p133_p5) target bundleno = 358 (0x166), region = 24  ;;  %s523_s20 = sshll.u32 (!%p133_p5), %s138_s18, 7 }
  0x21   : > { %s139_s21 = scalar_lea.sflag (!%p133_p5), [#allocation3], %s138_s18  ;;  %s723_s22 = scalar_lea.vmem (!%p133_p5), [#allocation2], %s523_s20 }
  0x25   : > { %617 = dma.done.wait (%p693_p7), %s139_s21, 2048  }
  0x26   : > { %619 = vsyncadd (%p693_p7), %s139_s21, 4294965248  ;;  %vm191_vm0 = vcmask 130048   ;;  %v177_v0 = vld [vmem:[%s723_s22 + $0x10] sm:$0xff]  ;;  %v175_v1 = vld [vmem:[%s723_s22] sm:$0xff]  ;;  %vm325_vm1 = vcmask 130112   ;;  %vm348_vm2 = vcmask 1041409  }
  0x27   : > { %v198_v2 = vsel %vm191_vm0, %v177_v0, 0.0  ;;  %v192_v3 = vsel %vm191_vm0, %v175_v1, 0.0  ;;  %v240_v4 = vmul.f32 %v175_v1, %v175_v1  ;;  %v176_v5 = vld [vmem:[%s723_s22 + $0x8] sm:$0xff]  ;;  %v178_v7 = vld [vmem:[%s723_s22 + $0x18] sm:$0xff]  ;;  %v242_v12 = vmul.f32 %v177_v0, %v177_v0  ;;  %v179_v14 = vld [vmem:[%s723_s22 + $0x20] sm:$0xff]  ;;  %p167_p6 = scmp.lt.s32.totalorder %s672_s13, 1 }
  0x28   : > { %199 = vadd.xlane.f32.xlu1 %v198_v2  ;;  %193 = vadd.xlane.f32.xlu0 %v192_v3  ;;  %v241_v8 = vmul.f32 %v176_v5, %v176_v5  ;;  %v201_v9 = vsel %vm191_vm0, %v178_v7, 0.0  ;;  %v195_v10 = vsel %vm191_vm0, %v176_v5, 0.0  ;;  %v243_v13 = vmul.f32 %v178_v7, %v178_v7  ;;  %v180_v18 = vld [vmem:[%s723_s22 + $0x28] sm:$0xff]  ;;  %v181_v24 = vld [vmem:[%s723_s22 + $0x30] sm:$0xff]  ;;  %v182_v25 = vld [vmem:[%s723_s22 + $0x38] sm:$0xff] }
  0x29   : > { %v256_v6 = vsel %vm191_vm0, %v240_v4, 0.0  ;;  %v262_v16 = vsel %vm191_vm0, %v242_v12, 0.0  ;;  %v204_v17 = vsel %vm191_vm0, %v179_v14, 0.0  ;;  %v244_v19 = vmul.f32 %v179_v14, %v179_v14  ;;  %v183_v31 = vld [vmem:[%s723_s22 + $0x40] sm:$0xff]  ;;  %v184_v32 = vld [vmem:[%s723_s22 + $0x48] sm:$0xff]  ;;  %v185_v38 = vld [vmem:[%s723_s22 + $0x50] sm:$0xff] }
  0x2a   : > { %257 = vadd.xlane.f32.xlu2 %v256_v6  ;;  %v259_v11 = vsel %vm191_vm0, %v241_v8, 0.0  ;;  %v265_v15 = vsel %vm191_vm0, %v243_v13, 0.0  ;;  %v245_v20 = vmul.f32 %v180_v18, %v180_v18  ;;  %v207_v22 = vsel %vm191_vm0, %v180_v18, 0.0  ;;  %v186_v42 = vld [vmem:[%s723_s22 + $0x58] sm:$0xff]  ;;  %v187_v48 = vld [vmem:[%s723_s22 + $0x60] sm:$0xff]  ;;  %v188_v49 = vld [vmem:[%s723_s22 + $0x68] sm:$0xff] }
  0x2b   : > { %v268_v21 = vsel %vm191_vm0, %v244_v19, 0.0  ;;  %v246_v26 = vmul.f32 %v181_v24, %v181_v24  ;;  %v213_v27 = vsel %vm191_vm0, %v182_v25, 0.0  ;;  %v210_v28 = vsel %vm191_vm0, %v181_v24, 0.0  ;;  %v189_v55 = vld [vmem:[%s723_s22 + $0x70] sm:$0xff]  ;;  %v190_v56 = vld [vmem:[%s723_s22 + $0x78] sm:$0xff]  ;;  %s881_s13 = smov (!%p167_p6, %s672_s13), 1 }
  0x2c   : > { %v271_v23 = vsel %vm191_vm0, %v245_v20, 0.0  ;;  %v247_v30 = vmul.f32 %v182_v25, %v182_v25  ;;  %v216_v33 = vsel %vm191_vm0, %v183_v31, 0.0  ;;  %v219_v35 = vsel %vm191_vm0, %v184_v32, 0.0  ;;  %s524_s12 = sshll.u32 %s881_s13, 3 }
  0x2d   : > { %v274_v29 = vsel %vm191_vm0, %v246_v26, 0.0  ;;  %v249_v36 = vmul.f32 %v184_v32, %v184_v32  ;;  %v248_v37 = vmul.f32 %v183_v31, %v183_v31  ;;  %v222_v41 = vsel %vm191_vm0, %v185_v38, 0.0  ;;  %s170_s24 = scalar_lea.vmem %s871_s1, %s524_s12  ;;  %s174_s27 = scalar_lea.vmem %s872_s2, %s524_s12 }
  0x2e   : > { %v277_v34 = vsel %vm191_vm0, %v247_v30, 0.0  ;;  %v250_v43 = vmul.f32 %v185_v38, %v185_v38  ;;  %v251_v44 = vmul.f32 %v186_v42, %v186_v42  ;;  %v225_v46 = vsel %vm191_vm0, %v186_v42, 0.0 }
  0x2f   : > { %v283_v39 = vsel %vm191_vm0, %v249_v36, 0.0  ;;  %v280_v40 = vsel %vm191_vm0, %v248_v37, 0.0  ;;  %v252_v50 = vmul.f32 %v187_v48, %v187_v48  ;;  %v231_v51 = vsel %vm191_vm0, %v188_v49, 0.0 }
  0x30   : > { %202 = vadd.xlane.f32.xlu1 %v201_v9  ;;  %196 = vadd.xlane.f32.xlu0 %v195_v10  ;;  %v286_v45 = vsel %vm191_vm0, %v250_v43, 0.0  ;;  %v289_v47 = vsel %vm191_vm0, %v251_v44, 0.0  ;;  %v228_v52 = vsel %vm191_vm0, %v187_v48, 0.0  ;;  %v253_v54 = vmul.f32 %v188_v49, %v188_v49 }
  0x31   : > { %v292_v53 = vsel %vm191_vm0, %v252_v50, 0.0  ;;  %v234_v57 = vsel %vm191_vm0, %v189_v55, 0.0  ;;  %v237_v59 = vsel %vm191_vm0, %v190_v56, 0.0  ;;  %v255_v60 = vmul.f32 %v190_v56, %v190_v56 }
  0x32   : > { %260 = vadd.xlane.f32.xlu2 %v259_v11  ;;  %v295_v58 = vsel %vm191_vm0, %v253_v54, 0.0  ;;  %v254_v61 = vmul.f32 %v189_v55, %v189_v55  ;;  %v320_v0 = vlaneseq  ;;  %vm350_vm3 = vcmask 1042434  }
  0x33   : > { %v301_v62 = vsel %vm191_vm0, %v255_v60, 0.0  ;;  %vm352_vm4 = vcmask 1043459   ;;  %vm354_vm5 = vcmask 1044484   ;;  %vm356_vm6 = vcmask 1045509  }
  0x34   : > { %v298_v63 = vsel %vm191_vm0, %v254_v61, 0.0  ;;  %v777_v4 = vand.u32 127, %v320_v0  ;;  %vm358_vm7 = vcmask 1046534   ;;  %vm360_vm8 = vcmask 1047559  }
  0x35   : > { %vm366_vm9 = vcmask 7168  }
  0x36   : > { %v780_v5 = vadd.s32 4294967288, %v777_v4 }
  0x38   : > { %266 = vadd.xlane.f32.xlu1 %v265_v15  ;;  %263 = vadd.xlane.f32.xlu0 %v262_v16 }
  0x3a   : > { %205 = vadd.xlane.f32.xlu2 %v204_v17 }
  0x40   : > { %269 = vadd.xlane.f32.xlu1 %v268_v21  ;;  %208 = vadd.xlane.f32.xlu0 %v207_v22 }
  0x42   : > { %272 = vadd.xlane.f32.xlu2 %v271_v23 }
  0x48   : > { %214 = vadd.xlane.f32.xlu1 %v213_v27  ;;  %211 = vadd.xlane.f32.xlu0 %v210_v28 }
  0x4a   : > { %275 = vadd.xlane.f32.xlu2 %v274_v29 }
  0x50   : > { %217 = vadd.xlane.f32.xlu1 %v216_v33  ;;  %278 = vadd.xlane.f32.xlu0 %v277_v34 }
  0x52   : > { %220 = vadd.xlane.f32.xlu2 %v219_v35 }
  0x58   : > { %284 = vadd.xlane.f32.xlu1 %v283_v39  ;;  %281 = vadd.xlane.f32.xlu0 %v280_v40 }
  0x5a   : > { %223 = vadd.xlane.f32.xlu2 %v222_v41 }
  0x60   : > { %287 = vadd.xlane.f32.xlu1 %v286_v45  ;;  %226 = vadd.xlane.f32.xlu0 %v225_v46 }
  0x62   : > { %290 = vadd.xlane.f32.xlu2 %v289_v47 }
  0x68   : > { %232 = vadd.xlane.f32.xlu1 %v231_v51  ;;  %229 = vadd.xlane.f32.xlu0 %v228_v52 }
  0x6a   : > { %293 = vadd.xlane.f32.xlu2 %v292_v53 }
  0x70   : > { %235 = vadd.xlane.f32.xlu1 %v234_v57  ;;  %296 = vadd.xlane.f32.xlu0 %v295_v58 }
  0x72   : > { %238 = vadd.xlane.f32.xlu2 %v237_v59 }
  0x78   : > { %302 = vadd.xlane.f32.xlu1 %v301_v62  ;;  %299 = vadd.xlane.f32.xlu0 %v298_v63 }
  0x9b   : > { %v200_v1 = vpop.xlane.xlu1 %199  ;;  %v194_v2 = vpop.xlane.xlu0 %193 }
  0x9c   : > { %v327_v8 = vperm.slane %v200_v1, %v777_v4  ;;  %v322_v9 = vperm.slane %v194_v2, %v777_v4 }
  0x9d   : > { %v258_v3 = vpop.xlane.xlu2 %257 }
  0x9e   : > { %v384_v13 = vperm.slane %v258_v3, %v777_v4 }
  0xa3   : > { %v203_v6 = vpop.xlane.xlu1 %202  ;;  %v197_v7 = vpop.xlane.xlu0 %196 }
  0xa4   : > { %v328_v10 = vperm.slane %v203_v6, %v780_v5  ;;  %v324_v11 = vperm.slane %v197_v7, %v780_v5 }
  0xa5   : > { %v261_v12 = vpop.xlane.xlu2 %260 }
  0xa6   : > { %v329_v14 = vsel %vm325_vm1, %v328_v10, %v327_v8  ;;  %v326_v15 = vsel %vm325_vm1, %v324_v11, %v322_v9  ;;  %v385_v16 = vperm.slane %v261_v12, %v780_v5 }
  0xa7   : > { %v349_v17 = vsel %vm348_vm2, %v329_v14, %v326_v15 }
  0xa8   : > { %v792_v18 = vsel %vm325_vm1, %v385_v16, %v384_v13 }
  0xab   : > { %v267_v19 = vpop.xlane.xlu1 %266  ;;  %v264_v20 = vpop.xlane.xlu0 %263 }
  0xac   : > { %v388_v44 = vperm.slane %v267_v19, %v780_v5  ;;  %v387_v45 = vperm.slane %v264_v20, %v777_v4 }
  0xad   : > { %v206_v21 = vpop.xlane.xlu2 %205 }
  0xae   : > { %v330_v39 = vperm.slane %v206_v21, %v777_v4  ;;  %v389_v54 = vsel %vm325_vm1, %v388_v44, %v387_v45 }
  0xaf   : > { %v408_v20 = vsel %vm348_vm2, %v389_v54, %v792_v18 }
  0xb3   : > { %v270_v22 = vpop.xlane.xlu1 %269  ;;  %v209_v23 = vpop.xlane.xlu0 %208 }
  0xb4   : > { %v331_v40 = vperm.slane %v209_v23, %v780_v5  ;;  %v390_v55 = vperm.slane %v270_v22, %v777_v4 }
  0xb5   : > { %v273_v24 = vpop.xlane.xlu2 %272 }
  0xb6   : > { %v332_v47 = vsel %vm325_vm1, %v331_v40, %v330_v39  ;;  %v391_v56 = vperm.slane %v273_v24, %v780_v5 }
  0xb7   : > { %v351_v57 = vsel %vm350_vm3, %v332_v47, %v349_v17 }
  0xb8   : > { %v392_v11 = vsel %vm325_vm1, %v391_v56, %v390_v55 }
  0xb9   : > { %v409_v23 = vsel %vm350_vm3, %v392_v11, %v408_v20 }
  0xbb   : > { %v215_v25 = vpop.xlane.xlu1 %214  ;;  %v212_v26 = vpop.xlane.xlu0 %211 }
  0xbc   : > { %v334_v41 = vperm.slane %v215_v25, %v780_v5  ;;  %v333_v42 = vperm.slane %v212_v26, %v777_v4 }
  0xbd   : > { %v276_v27 = vpop.xlane.xlu2 %275 }
  0xbe   : > { %v335_v50 = vsel %vm325_vm1, %v334_v41, %v333_v42  ;;  %v393_v58 = vperm.slane %v276_v27, %v777_v4 }
  0xbf   : > { %v353_v62 = vsel %vm352_vm4, %v335_v50, %v351_v57 }
  0xc3   : > { %v218_v28 = vpop.xlane.xlu1 %217  ;;  %v279_v29 = vpop.xlane.xlu0 %278 }
  0xc4   : > { %v336_v51 = vperm.slane %v218_v28, %v777_v4  ;;  %v394_v63 = vperm.slane %v279_v29, %v780_v5 }
  0xc5   : > { %v221_v30 = vpop.xlane.xlu2 %220 }
  0xc6   : > { %v337_v46 = vperm.slane %v221_v30, %v780_v5  ;;  %v395_v15 = vsel %vm325_vm1, %v394_v63, %v393_v58 }
  0xc7   : > { %v410_v26 = vsel %vm352_vm4, %v395_v15, %v409_v23 }
  0xc8   : > { %v338_v59 = vsel %vm325_vm1, %v337_v46, %v336_v51 }
  0xc9   : > { %v355_v7 = vsel %vm354_vm5, %v338_v59, %v353_v62 }
  0xcb   : > { %v285_v31 = vpop.xlane.xlu1 %284  ;;  %v282_v32 = vpop.xlane.xlu0 %281 }
  0xcc   : > { %v397_v1 = vperm.slane %v285_v31, %v780_v5  ;;  %v396_v2 = vperm.slane %v282_v32, %v777_v4 }
  0xcd   : > { %v224_v33 = vpop.xlane.xlu2 %223 }
  0xce   : > { %v339_v48 = vperm.slane %v224_v33, %v777_v4  ;;  %v398_v21 = vsel %vm325_vm1, %v397_v1, %v396_v2 }
  0xcf   : > { %v411_v18 = vsel %vm354_vm5, %v398_v21, %v410_v26 }
  0xd3   : > { %v288_v34 = vpop.xlane.xlu1 %287  ;;  %v227_v35 = vpop.xlane.xlu0 %226 }
  0xd4   : > { %v340_v49 = vperm.slane %v227_v35, %v780_v5  ;;  %v399_v16 = vperm.slane %v288_v34, %v777_v4 }
  0xd5   : > { %v291_v36 = vpop.xlane.xlu2 %290 }
  0xd6   : > { %v341_v0 = vsel %vm325_vm1, %v340_v49, %v339_v48  ;;  %v400_v8 = vperm.slane %v291_v36, %v780_v5 }
  0xd7   : > { %v357_v14 = vsel %vm356_vm6, %v341_v0, %v355_v7 }
  0xd8   : > { %v401_v24 = vsel %vm325_vm1, %v400_v8, %v399_v16 }
  0xd9   : > { %v412_v32 = vsel %vm356_vm6, %v401_v24, %v411_v18 }
  0xdb   : > { %v233_v37 = vpop.xlane.xlu1 %232  ;;  %v230_v38 = vpop.xlane.xlu0 %229 }
  0xdc   : > { %v343_v52 = vperm.slane %v233_v37, %v780_v5  ;;  %v342_v53 = vperm.slane %v230_v38, %v777_v4 }
  0xdd   : > { %v294_v43 = vpop.xlane.xlu2 %293 }
  0xde   : > { %v344_v3 = vsel %vm325_vm1, %v343_v52, %v342_v53  ;;  %v402_v12 = vperm.slane %v294_v43, %v777_v4 }
  0xdf   : > { %v359_v19 = vsel %vm358_vm7, %v344_v3, %v357_v14 }
  0xe3   : > { %v236_v60 = vpop.xlane.xlu1 %235  ;;  %v297_v61 = vpop.xlane.xlu0 %296 }
  0xe4   : > { %v345_v9 = vperm.slane %v236_v60, %v777_v4  ;;  %v403_v13 = vperm.slane %v297_v61, %v780_v5 }
  0xe5   : > { %v239_v6 = vpop.xlane.xlu2 %238 }
  0xe6   : > { %v346_v10 = vperm.slane %v239_v6, %v780_v5  ;;  %v404_v27 = vsel %vm325_vm1, %v403_v13, %v402_v12 }
  0xe7   : > { %v413_v34 = vsel %vm358_vm7, %v404_v27, %v412_v32 }
  0xe8   : > { %v347_v17 = vsel %vm325_vm1, %v346_v10, %v345_v9 }
  0xe9   : > { %v361_v22 = vsel %vm360_vm8, %v347_v17, %v359_v19 }
  0xea   : > { %v363_v25 = vsel %vm191_vm0, %v361_v22, 0.0 }
  0xeb   : > { %v303_v28 = vpop.xlane.xlu1 %302  ;;  %364 = vadd.xlane.f32.xlu2 %v363_v25  ;;  %v300_v29 = vpop.xlane.xlu0 %299 }
  0xec   : > { %v406_v30 = vperm.slane %v303_v28, %v780_v5  ;;  %v405_v31 = vperm.slane %v300_v29, %v777_v4 }
  0xee   : > { %v407_v33 = vsel %vm325_vm1, %v406_v30, %v405_v31 }
  0xef   : > { %v414_v35 = vsel %vm360_vm8, %v407_v33, %v413_v34 }
  0xf0   : > { %v416_v36 = vsel %vm191_vm0, %v414_v35, 0.0 }
  0xf1   : > { %417 = vadd.xlane.f32.xlu0 %v416_v36 }
 0x15e   : > { %v365_v4 = vpop.xlane.xlu2 %364 }
 0x15f   : > { %367 = vst.msk [vmem:[%s170_s24] sm:$0xff] %vm366_vm9, %v365_v4 }
 0x164   : > { %v418_v5 = vpop.xlane.xlu0 %417 }
 0x165   : > { %419 = vst.msk [vmem:[%s174_s27] sm:$0xff] %vm366_vm9, %v418_v5 }
 0x166 PF: > { %p13_p7 = scmp.ge.s32.totalorder %s675_s14, 4   ;;  %s876_s9 = smov %s626_s10 }
 0x167   : > { %s877_s10 = smov %s630_s11  ;;  %s878_s11 = smov %s685_s17 }
 0x168   : > { %s879_s12 = smov %s675_s14  ;;  %15 = sbr.rel (!%p13_p7) target bundleno = 3 (0x3), region = 76 }
 0x16d   :  { %453 = vsyncpa [#allocation3], 1 }
 0x16e   :  { %455 = vsyncpa [#allocation3 + $0x1], 1 }

</bundles_post_ra>
